<compile_context>
chip_gen: v6e
topology: v6e:2x2x1
jax: 0.10.0
libtpu: 0.0.40
codegen_flags: <defaults>
</compile_context>

<pallas_src>
import functools

import jax
import jax.numpy as jnp
from jax.experimental import pallas as pl
from jax.experimental.pallas import tpu as pltpu

FIR_LEN = 61
HALF = (FIR_LEN - 1) // 2     # 30
LANE = 128
PAD = 128                     # zero margin per side (>= 2*HALF, lane aligned)


def _pt_wave_kernel(x_ref, o_ref, xp_ref, *, n, pad):
    # x_ref:  (tb, n)  f32 — raw signal rows.
    # o_ref:  (tb, nr) f32 — standardized filtered rows (first n lanes are valid).
    # xp_ref: (tb, m)  f32 VMEM scratch — zero-padded, mean-removed signal.
    tb, m = xp_ref.shape
    nr = o_ref.shape[1]
    inv_n = jnp.float32(1.0 / n)

    # --- Step 1: remove the mean and embed into the zero-padded lane buffer -----
    xv = x_ref[...]                                              # (tb, n)
    mean1 = jnp.sum(xv, axis=1, keepdims=True) * inv_n           # (tb, 1)
    xp_ref[...] = jnp.zeros_like(xp_ref)
    xp_ref[:, pad:pad + n] = xv - mean1                          # margins stay zero
    xc = xp_ref[...]                                             # (tb, m)

    # --- Step 2: 61-tap all-ones FIR == 61-wide sliding-window sum --------------
    # One-sided window sums built by doubling, then composed (61 = 32+16+8+4+1),
    # then re-centered.  The >= 60-lane zero margins on both sides guarantee the
    # circular rolls never contaminate valid output lanes, so this reproduces
    # torch.conv1d with explicit zero padding of 30 exactly.
    def shift(v, k):                                             # access lanes k away
        return pltpu.roll(v, m - k, axis=1)

    s1 = xc
    s2 = s1 + shift(s1, 1)
    s4 = s2 + shift(s2, 2)
    s8 = s4 + shift(s4, 4)
    s16 = s8 + shift(s8, 8)
    s32 = s16 + shift(s16, 16)
    pa = s32 + shift(s16, 32)                                    # taps 0..47
    pb = shift(s8, 48) + shift(s4, 56)                           # taps 48..59
    t = pa + pb + shift(s1, 60)                                  # taps 0..60 (width 61)
    y = pltpu.roll(t, HALF, axis=1)                              # re-center: +/-30 window

    # --- Step 3: standardization statistics, one fused reduction tree -----------
    pos = jax.lax.broadcasted_iota(jnp.int32, (tb, m), 1)
    valid = (pos >= pad) & (pos < pad + n)
    ym = jnp.where(valid, y, jnp.float32(0.0))

    stacked = jnp.concatenate([ym, ym * ym], axis=0)             # (2*tb, m)
    sums = jnp.sum(stacked, axis=1, keepdims=True)               # (2*tb, 1)
    s_lin = sums[:tb]
    s_sq = sums[tb:]
    mean2 = s_lin * inv_n
    # Unbiased variance, single pass (mean2 is tiny since x was mean-removed first).
    var = (s_sq - jnp.float32(n) * mean2 * mean2) * jnp.float32(1.0 / (n - 1))
    inv_std = jax.lax.rsqrt(var)

    # Lane-dense store; valid lanes start at the 128-aligned offset `pad`.
    o_ref[...] = (y[:, pad:pad + nr] - mean2) * inv_std


def pt_wave_forward(x: jax.Array) -> jax.Array:
    """x: (N,) or (B, N) float32 signal(s). Returns same shape, matching forward()."""
    squeeze = x.ndim == 1
    xb = (x[None, :] if squeeze else x).astype(jnp.float32)
    b, n = xb.shape
    assert n > 1, "need at least 2 samples (unbiased std divides by n-1)"

    nr = pl.cdiv(n, LANE) * LANE              # lane-dense output width
    m = nr + 2 * PAD                          # padded buffer width (multiple of 128)
    tb = 8 if (b % 8 == 0) else b             # batch tile along sublanes
    grid = (b // tb,)

    out = pl.pallas_call(
        functools.partial(_pt_wave_kernel, n=n, pad=PAD),
        grid=grid,
        in_specs=[pl.BlockSpec((tb, n), lambda i: (i, 0))],
        out_specs=pl.BlockSpec((tb, nr), lambda i: (i, 0)),
        out_shape=jax.ShapeDtypeStruct((b, nr), jnp.float32),
        scratch_shapes=[pltpu.VMEM((tb, m), jnp.float32)],
        compiler_params=pltpu.CompilerParams(dimension_semantics=("parallel",)),
    )(xb)

    out = out[:, :n]
    return out[0] if squeeze else out


def _reference_forward(x_1d: jax.Array) -> jax.Array:
    """Pure-JAX reference mirroring the PyTorch module, for a correctness check."""
    x = x_1d.astype(jnp.float32)
    n = x.shape[0]
    x = x - jnp.mean(x)
    xp = jnp.concatenate([jnp.zeros(HALF, jnp.float32), x, jnp.zeros(HALF, jnp.float32)])
    w = jnp.ones((FIR_LEN,), jnp.float32)
    y = jnp.convolve(xp, w, mode="valid")                 # box filter (symmetric taps)
    mean2 = jnp.mean(y)
    std = jnp.sqrt(jnp.sum((y - mean2) ** 2) / (n - 1))   # unbiased, like torch.std
    return (y - mean2) / std


if __name__ == "__main__":
    key = jax.random.PRNGKey(0)
    k1, k2 = jax.random.split(key)

    # Single waveform, length not a multiple of 128 (exercises the masked tail path).
    n = 1000
    x = jax.random.normal(k1, (n,), dtype=jnp.float32)
    out = jax.block_until_ready(pt_wave_forward(x))
    ref = _reference_forward(x)
    assert out.shape == (n,)
    err = float(jnp.max(jnp.abs(out - ref)))
    assert jnp.allclose(out, ref, atol=2e-3, rtol=2e-3), err

    # Small batch along the sublane axis.
    b, n2 = 4, 512
    xbat = jax.random.normal(k2, (b, n2), dtype=jnp.float32)
    outb = jax.block_until_ready(pt_wave_forward(xbat))
    refb = jax.vmap(_reference_forward)(xbat)
    assert outb.shape == (b, n2)
    errb = float(jnp.max(jnp.abs(outb - refb)))
    assert jnp.allclose(outb, refb, atol=2e-3, rtol=2e-3), errb

    # TODO(synk): PTWaveDetection.run() (numba peakdet + data-dependent per-R-peak
    # slicing into variable-length lists) is host-side sequential control flow;
    # it has no Pallas equivalent and is intentionally not implemented.
    print("KERNEL_OK")
</pallas_src>

<mosaic_0001>
module attributes {stable_mosaic.version = 11 : i64} {
  func.func @_pt_wave_kernel(%arg0: i32, %arg1: memref<1x1000xf32, #tpu.memory_space<vmem>>, %arg2: memref<1x1024xf32, #tpu.memory_space<vmem>>, %arg3: memref<1x1280xf32, #tpu.memory_space<vmem>>) attributes {dimension_semantics = [#tpu.dimension_semantics<parallel>], iteration_bounds = array<i64: 1>, scalar_prefetch = 0 : i64, scratch_operands = 1 : i64, tpu.core_type = #tpu.core_type<tc>, window_params = [{transform_indices = @transform_0, window_bounds = array<i64: 1, 1000>}, {transform_indices = @transform_1, window_bounds = array<i64: 1, 1024>}]} {
    %c0 = arith.constant 0 : index
    %c0_0 = arith.constant 0 : index
    %0 = vector.load %arg1[%c0, %c0_0] : memref<1x1000xf32, #tpu.memory_space<vmem>>, vector<1x1000xf32>
    %cst = arith.constant dense<0.000000e+00> : vector<1xf32>
    %1 = vector.multi_reduction <add>, %0, %cst [1] : vector<1x1000xf32> to vector<1xf32>
    %2 = vector.shape_cast %1 : vector<1xf32> to vector<1x1xf32>
    %cst_1 = arith.constant 1.000000e-03 : f32
    %3 = vector.broadcast %cst_1 : f32 to vector<1x1xf32>
    %4 = arith.mulf %2, %3 : vector<1x1xf32>
    %cst_2 = arith.constant 0.000000e+00 : f32
    %5 = vector.broadcast %cst_2 : f32 to vector<1x1280xf32>
    %c0_3 = arith.constant 0 : index
    %c0_4 = arith.constant 0 : index
    %6 = vector.load %arg3[%c0_3, %c0_4] : memref<1x1280xf32, #tpu.memory_space<vmem>>, vector<1x1280xf32>
    tpu.vector_store %arg3[%c0_3, %c0_4], %5 {strides = array<i32>} : memref<1x1280xf32, #tpu.memory_space<vmem>>, vector<1x1280xf32>,
    %7 = vector.broadcast %4 : vector<1x1xf32> to vector<1x1000xf32>
    %8 = arith.subf %0, %7 : vector<1x1000xf32>
    %c0_5 = arith.constant 0 : index
    %c128 = arith.constant 128 : index
    %9 = vector.load %arg3[%c0_5, %c128] : memref<1x1280xf32, #tpu.memory_space<vmem>>, vector<1x1000xf32>
    tpu.vector_store %arg3[%c0_5, %c128], %8 {strides = array<i32>} : memref<1x1280xf32, #tpu.memory_space<vmem>>, vector<1x1000xf32>,
    %c0_6 = arith.constant 0 : index
    %c0_7 = arith.constant 0 : index
    %10 = vector.load %arg3[%c0_6, %c0_7] : memref<1x1280xf32, #tpu.memory_space<vmem>>, vector<1x1280xf32>
    %c1279_i32 = arith.constant 1279 : i32
    %11 = tpu.dynamic_rotate %10 by %c1279_i32 dim 1 : vector<1x1280xf32>, i32 -> vector<1x1280xf32>
    %12 = arith.addf %10, %11 : vector<1x1280xf32>
    %c1278_i32 = arith.constant 1278 : i32
    %13 = tpu.dynamic_rotate %12 by %c1278_i32 dim 1 : vector<1x1280xf32>, i32 -> vector<1x1280xf32>
    %14 = arith.addf %12, %13 : vector<1x1280xf32>
    %c1276_i32 = arith.constant 1276 : i32
    %15 = tpu.dynamic_rotate %14 by %c1276_i32 dim 1 : vector<1x1280xf32>, i32 -> vector<1x1280xf32>
    %16 = arith.addf %14, %15 : vector<1x1280xf32>
    %c1272_i32 = arith.constant 1272 : i32
    %17 = tpu.dynamic_rotate %16 by %c1272_i32 dim 1 : vector<1x1280xf32>, i32 -> vector<1x1280xf32>
    %18 = arith.addf %16, %17 : vector<1x1280xf32>
    %c1264_i32 = arith.constant 1264 : i32
    %19 = tpu.dynamic_rotate %18 by %c1264_i32 dim 1 : vector<1x1280xf32>, i32 -> vector<1x1280xf32>
    %20 = arith.addf %18, %19 : vector<1x1280xf32>
    %c1248_i32 = arith.constant 1248 : i32
    %21 = tpu.dynamic_rotate %18 by %c1248_i32 dim 1 : vector<1x1280xf32>, i32 -> vector<1x1280xf32>
    %22 = arith.addf %20, %21 : vector<1x1280xf32>
    %c1232_i32 = arith.constant 1232 : i32
    %23 = tpu.dynamic_rotate %16 by %c1232_i32 dim 1 : vector<1x1280xf32>, i32 -> vector<1x1280xf32>
    %c1224_i32 = arith.constant 1224 : i32
    %24 = tpu.dynamic_rotate %14 by %c1224_i32 dim 1 : vector<1x1280xf32>, i32 -> vector<1x1280xf32>
    %25 = arith.addf %23, %24 : vector<1x1280xf32>
    %26 = arith.addf %22, %25 : vector<1x1280xf32>
    %c1220_i32 = arith.constant 1220 : i32
    %27 = tpu.dynamic_rotate %10 by %c1220_i32 dim 1 : vector<1x1280xf32>, i32 -> vector<1x1280xf32>
    %28 = arith.addf %26, %27 : vector<1x1280xf32>
    %c30_i32 = arith.constant 30 : i32
    %29 = tpu.dynamic_rotate %28 by %c30_i32 dim 1 : vector<1x1280xf32>, i32 -> vector<1x1280xf32>
    %30 = tpu.iota {dimensions = array<i32: 1>} : vector<1x1280xi32>
    %c128_i32 = arith.constant 128 : i32
    %31 = vector.broadcast %c128_i32 : i32 to vector<1x1280xi32>
    %32 = arith.cmpi sge, %30, %31 : vector<1x1280xi32>
    %c1128_i32 = arith.constant 1128 : i32
    %33 = vector.broadcast %c1128_i32 : i32 to vector<1x1280xi32>
    %34 = arith.cmpi slt, %30, %33 : vector<1x1280xi32>
    %35 = arith.andi %32, %34 : vector<1x1280xi1>
    %cst_8 = arith.constant 0.000000e+00 : f32
    %36 = vector.broadcast %cst_8 : f32 to vector<1x1280xf32>
    %37 = arith.select %35, %29, %36 : vector<1x1280xi1>, vector<1x1280xf32>
    %38 = arith.mulf %37, %37 : vector<1x1280xf32>
    %39 = tpu.concatenate %37, %38 in 0 : vector<1x1280xf32>, vector<1x1280xf32> -> vector<2x1280xf32>
    %cst_9 = arith.constant dense<0.000000e+00> : vector<2xf32>
    %40 = vector.multi_reduction <add>, %39, %cst_9 [1] : vector<2x1280xf32> to vector<2xf32>
    %41 = vector.shape_cast %40 : vector<2xf32> to vector<2x1xf32>
    %42 = vector.extract_strided_slice %41 {offsets = [0, 0], sizes = [1, 1], strides = [1, 1]} : vector<2x1xf32> to vector<1x1xf32>
    %43 = vector.extract_strided_slice %41 {offsets = [1, 0], sizes = [1, 1], strides = [1, 1]} : vector<2x1xf32> to vector<1x1xf32>
    %cst_10 = arith.constant 1.000000e-03 : f32
    %44 = vector.broadcast %cst_10 : f32 to vector<1x1xf32>
    %45 = arith.mulf %42, %44 : vector<1x1xf32>
    %cst_11 = arith.constant 1.000000e+03 : f32
    %46 = vector.broadcast %cst_11 : f32 to vector<1x1xf32>
    %47 = arith.mulf %46, %45 : vector<1x1xf32>
    %48 = arith.mulf %47, %45 : vector<1x1xf32>
    %49 = arith.subf %43, %48 : vector<1x1xf32>
    %cst_12 = arith.constant 0.00100100099 : f32
    %50 = vector.broadcast %cst_12 : f32 to vector<1x1xf32>
    %51 = arith.mulf %49, %50 : vector<1x1xf32>
    %52 = math.rsqrt %51 : vector<1x1xf32>
    %53 = vector.extract_strided_slice %29 {offsets = [0, 128], sizes = [1, 1024], strides = [1, 1]} : vector<1x1280xf32> to vector<1x1024xf32>
    %54 = vector.broadcast %45 : vector<1x1xf32> to vector<1x1024xf32>
    %55 = arith.subf %53, %54 : vector<1x1024xf32>
    %56 = vector.broadcast %52 : vector<1x1xf32> to vector<1x1024xf32>
    %57 = arith.mulf %55, %56 : vector<1x1024xf32>
    %c0_13 = arith.constant 0 : index
    %c0_14 = arith.constant 0 : index
    %58 = vector.load %arg2[%c0_13, %c0_14] : memref<1x1024xf32, #tpu.memory_space<vmem>>, vector<1x1024xf32>
    tpu.vector_store %arg2[%c0_13, %c0_14], %57 {strides = array<i32>} : memref<1x1024xf32, #tpu.memory_space<vmem>>, vector<1x1024xf32>,
    return
  }
  func.func @transform_0(%arg0: i32) -> (i32, i32) {
    %c0_i32 = arith.constant 0 : i32
    %c0_i32_0 = arith.constant 0 : i32
    return %arg0, %c0_i32 : i32, i32
  }
  func.func @transform_1(%arg0: i32) -> (i32, i32) {
    %c0_i32 = arith.constant 0 : i32
    %c0_i32_0 = arith.constant 0 : i32
    return %arg0, %c0_i32 : i32, i32
  }
}

</mosaic_0001>

<bundles_post_ra>
// kernel: tpu_custom_call.1
= control target key start
LH: loop header
LB: loop body
LE: loop exit
PB: predicated region body
PF: predicated region fallthrough
CT: control target
= control target key end

     0   :  { %6 = vsyncpa [#allocation4], 0  ;;  %s2388_s0 = inlined_call_operand.hbm [shape: f32[1,1000], index: 0, kind: input, shape index: {}]   ;;  %s2389_s1 = inlined_call_operand.hbm [shape: f32[1,1024], index: 1, kind: output, shape index: {}]  }
   0x1   :  { %7 = vsyncpa [#allocation5], 0  ;;  %s1647_s6 = smov [#allocation3]  }
   0x2   :  { %s14_s7 = sshll.u32 %s1647_s6, 4  ;;  %s15_s7 = int_to_ptr.vmem [resolvable:$true] %s14_s7 }
   0x3   :  { %s1611_s8 = scalar_lea.vmem %s15_s7, 128  ;;  %p1616_p1 = scmp.lt.s32.totalorder %s15_s7, %s15_s7 }
   0x4   :  { %p1612_p0 = scmp.ne.s32.totalorder %s15_s7, %s1611_s8  ;;  %p1617_p2 = scmp.lt.s32.totalorder %s1611_s8, %s1611_s8 }
   0x6   :  { %p1618_p3 = por %p1617_p2, %p1616_p1 }
   0x8   :  { %p1619_p4 = pnand %p1618_p3, %p1612_p0 }
   0xa   :  { %1622 = shalt.err (!%p1619_p4)
}
   0xb   :  { %17 = dma.hbm_to_vmem [thread:$0]  %s2388_s0, 128, %s15_s7, [#allocation4]  }
   0xc   :  { %1643 = dma.done.wait [#allocation4], 128  }
   0xd   :  { %1644 = vsyncadd [#allocation4], 4294967168  ;;  %v23_v0 = vlaneseq  ;;  %v1648_v1 = vmov 0.0   ;;  %v21_v8 = vld [vmem:[#allocation3] sm:$0xff]  ;;  %vm63_vm1 = vcmask 1040384   ;;  %vm77_vm2 = vcmask 843776  }
   0xe   :  { %83 = vst [vmem:[#allocation2] sm:$0xff] %v1648_v1  ;;  %s1649_s0 = smov 127   ;;  %v1650_v56 = vmov 1966171168   ;;  %s1651_s11 = smov 126   ;;  %vm1458_vm14 = vcmask 1041408  }
   0xf   :  { %v1677_v2 = vshrl.u32 %v23_v0, 7  ;;  %vm86_vm0 = vcmp.lt.s32.totalorder %v23_v0, 256  ;;  %vm96_vm3 = vcmp.lt.s32.totalorder %v23_v0, 1000  ;;  %v1777_v54 = vand.u32 127, %v23_v0  ;;  %s1652_s12 = smov 124   ;;  %s1653_s13 = smov 72  }
  0x10   :  { %88 = vst.msk [vmem:[#allocation2 + $0x8] sm:$0x3] %vm86_vm0, %v1648_v1  ;;  %v201_v57 = vunpack.c.l.s4 %v1650_v56  ;;  %s1654_s14 = smov 120   ;;  %s1655_s15 = smov 80  }
  0x11   :  { %v1682_v3 = vsub.s32 0, %v1677_v2  ;;  %v1685_v4 = vsub.s32 1, %v1677_v2  ;;  %v1688_v5 = vsub.s32 2, %v1677_v2  ;;  %v1691_v6 = vsub.s32 3, %v1677_v2  ;;  %s1656_s16 = smov 68   ;;  %s1657_s17 = smov 96  }
  0x12   :  { %v1694_v7 = vsub.s32 4, %v1677_v2  ;;  %v1697_v9 = vsub.s32 5, %v1677_v2  ;;  %v1704_v14 = vsub.s32 6, %v1677_v2  ;;  %v1712_v21 = vsub.s32 7, %v1677_v2  ;;  %s1658_s18 = smov 112   ;;  %s1659_s19 = smov 30  }
  0x13   :  { %v26_v10 = vrot.slane %v21_v8, %v1682_v3  ;;  %v30_v11 = vrot.slane %v21_v8, %v1685_v4  ;;  %v34_v12 = vrot.slane %v21_v8, %v1688_v5  ;;  %v38_v13 = vrot.slane %v21_v8, %v1691_v6  ;;  %s1661_s20 = smov [#allocation6]  }
  0x14   :  { %v42_v15 = vrot.slane %v21_v8, %v1694_v7  ;;  %v46_v20 = vrot.slane %v21_v8, %v1697_v9  ;;  %v50_v24 = vrot.slane %v21_v8, %v1704_v14  ;;  %v54_v27 = vrot.slane %v21_v8, %v1712_v21  ;;  %s1576_s21 = sshll.u32 %s1661_s20, 4  ;;  %s1577_s21 = int_to_ptr.vmem [resolvable:$true] %s1576_s21 }
  0x15   :  { %v64_v16 = vsel %vm63_vm1, %v26_v10, 0.0  ;;  %v65_v17 = vsel %vm63_vm1, %v30_v11, 0.0  ;;  %v67_v18 = vsel %vm63_vm1, %v34_v12, 0.0  ;;  %v69_v22 = vsel %vm63_vm1, %v38_v13, 0.0  ;;  %s1623_s22 = scalar_lea.vmem %s1577_s21, 128  ;;  %p1628_p6 = scmp.lt.s32.totalorder %s1577_s21, %s1577_s21 }
  0x16   :  { %v66_v19 = vadd.f32 %v65_v17, %v64_v16  ;;  %v71_v25 = vsel %vm63_vm1, %v42_v15, 0.0  ;;  %v73_v28 = vsel %vm63_vm1, %v46_v20, 0.0  ;;  %v75_v30 = vsel %vm63_vm1, %v50_v24, 0.0  ;;  %p1624_p5 = scmp.ne.s32.totalorder %s1577_s21, %s1623_s22  ;;  %p1629_p7 = scmp.lt.s32.totalorder %s1623_s22, %s1623_s22 }
  0x17   :  { %v78_v32 = vsel %vm77_vm2, %v54_v27, 0.0  ;;  %vm175_vm4 = vcmp.lt.s32.totalorder %v1777_v54, 127  ;;  %v202_v60 = vunpack.c.0.s8 %v201_v57  ;;  %vm336_vm5 = vcmp.lt.s32.totalorder %v1777_v54, 126 }
  0x18   :  { %v68_v23 = vadd.f32 %v67_v18, %v66_v19  ;;  %vm497_vm6 = vcmp.lt.s32.totalorder %v1777_v54, 124  ;;  %vm658_vm7 = vcmp.lt.s32.totalorder %v1777_v54, 120  ;;  %vm1068_vm8 = vcmp.lt.s32.totalorder %v1777_v54, 72  ;;  %p1630_p8 = por %p1629_p7, %p1628_p6 }
  0x19   :  { %v1791_v12 = vsub.s32 %v202_v60, %v1677_v2  ;;  %vm1187_vm9 = vcmp.lt.s32.totalorder %v1777_v54, 68  ;;  %vm1037_vm10 = vcmp.lt.s32.totalorder %v1777_v54, 80  ;;  %vm819_vm11 = vcmp.lt.s32.totalorder %v1777_v54, 112 }
  0x1a   :  { %v70_v26 = vadd.f32 %v69_v22, %v68_v23  ;;  %vm928_vm12 = vcmp.lt.s32.totalorder %v1777_v54, 96  ;;  %vm1348_vm13 = vcmp.lt.s32.totalorder %v1777_v54, 30  ;;  %p1631_p9 = pnand %p1630_p8, %p1624_p5 }
  0x1c   :  { %v72_v29 = vadd.f32 %v71_v25, %v70_v26 }
  0x1e   :  { %v74_v31 = vadd.f32 %v73_v28, %v72_v29 }
  0x20   :  { %v76_v33 = vadd.f32 %v75_v30, %v74_v31 }
  0x22   :  { %v79_v34 = vadd.f32 %v78_v32, %v76_v33 }
  0x24   :  { %80 = vadd.xlane.f32.xlu0 %v79_v34 }
  0xad   :  { %v81_v35 = vpop.xlane.xlu0 %80 }
  0xae   :  { %v82_v36 = vmul.f32 0.001, %v81_v35 }
  0xb0   :  { %v93_v37 = vrot.slane %v82_v36, %v1682_v3 }
  0xb2   :  { %v95_v38 = vsub.f32 %v21_v8, %v93_v37 }
  0xb4   :  { %98 = vst.msk [vmem:[#allocation2 + $0x1] sm:$0xff] %vm96_vm3, %v95_v38 }
  0xbb   :  { %v1722_v39 = vld [vmem:[#allocation2] sm:$0xff]  ;;  %v1732_v42 = vld [vmem:[#allocation2 + $0x8] sm:$0x3] }
  0xbc   :  { %v1726_v40 = vrot.slane %v1722_v39, %v1685_v4  ;;  %v1730_v41 = vrot.slane %v1722_v39, %v1682_v3  ;;  %v1738_v43 = vrot.slane %v1722_v39, %v1688_v5  ;;  %v1742_v44 = vrot.slane %v1732_v42, %v1682_v3 }
  0xbd   :  { %v1748_v45 = vrot.slane %v1722_v39, %v1691_v6  ;;  %v1753_v46 = vrot.slane %v1722_v39, %v1694_v7  ;;  %v1758_v47 = vrot.slane %v1722_v39, %v1697_v9  ;;  %v1763_v48 = vrot.slane %v1722_v39, %v1704_v14 }
  0xbe   :  { %155 = vrot.lane.b32.xlu1 %v1726_v40, %s1649_s0  ;;  %153 = vrot.lane.b32.xlu0 %v1730_v41, %s1649_s0  ;;  %v1768_v49 = vrot.slane %v1722_v39, %v1712_v21  ;;  %v1773_v50 = vrot.slane %v1732_v42, %v1685_v4 }
  0xc2   :  { %157 = vrot.lane.b32.xlu1 %v1738_v43, %s1649_s0  ;;  %169 = vrot.lane.b32.xlu0 %v1742_v44, %s1649_s0 }
  0xc6   :  { %159 = vrot.lane.b32.xlu1 %v1748_v45, %s1649_s0 }
  0xca   :  { %161 = vrot.lane.b32.xlu1 %v1753_v46, %s1649_s0 }
  0xce   :  { %163 = vrot.lane.b32.xlu1 %v1758_v47, %s1649_s0 }
  0xd2   :  { %165 = vrot.lane.b32.xlu1 %v1763_v48, %s1649_s0 }
  0xd6   :  { %167 = vrot.lane.b32.xlu1 %v1768_v49, %s1649_s0 }
  0xda   :  { %171 = vrot.lane.b32.xlu1 %v1773_v50, %s1649_s0 }
 0x130   :  { %v156_v51 = vpop.permute.xlu1 %155  ;;  %v154_v61 = vpop.permute.xlu0 %153 }
 0x131   :  { %v184_v10 = vsel %vm175_vm4, %v154_v61, %v156_v51 }
 0x134   :  { %v158_v52 = vpop.permute.xlu1 %157  ;;  %v170_v16 = vpop.permute.xlu0 %169 }
 0x135   :  { %v183_v62 = vsel %vm175_vm4, %v156_v51, %v158_v52 }
 0x136   :  { %v196_v13 = vcombine.low %v184_v10, %v183_v62 }
 0x138   :  { %v160_v53 = vpop.permute.xlu1 %159  ;;  %v206_v23 = vrot.slane %v196_v13, %v1791_v12 }
 0x139   :  { %v182_v63 = vsel %vm175_vm4, %v158_v52, %v160_v53 }
 0x13c   :  { %v162_v55 = vpop.permute.xlu1 %161 }
 0x13d   :  { %v181_v59 = vsel %vm175_vm4, %v160_v53, %v162_v55 }
 0x13e   :  { %v197_v8 = vcombine.low %v182_v63, %v181_v59 }
 0x140   :  { %v164_v58 = vpop.permute.xlu1 %163  ;;  %v213_v17 = vrot.slane %v197_v8, %v1791_v12 }
 0x141   :  { %v180_v15 = vsel %vm175_vm4, %v162_v55, %v164_v58 }
 0x142   :  { %v228_v2 = vcombine.low %v206_v23, %v213_v17 }
 0x144   :  { %v166_v0 = vpop.permute.xlu1 %165  ;;  %v236_v28 = vrot.slane %v228_v2, %v1791_v12 }
 0x145   :  { %v179_v11 = vsel %vm175_vm4, %v164_v58, %v166_v0 }
 0x146   :  { %v198_v18 = vcombine.low %v180_v15, %v179_v11 }
 0x148   :  { %v168_v19 = vpop.permute.xlu1 %167  ;;  %v220_v25 = vrot.slane %v198_v18, %v1791_v12 }
 0x149   :  { %v177_v20 = vsel %vm175_vm4, %v168_v19, %v170_v16  ;;  %v178_v22 = vsel %vm175_vm4, %v166_v0, %v168_v19 }
 0x14a   :  { %v199_v24 = vcombine.low %v178_v22, %v177_v20 }
 0x14c   :  { %v227_v26 = vrot.slane %v199_v24, %v1791_v12  ;;  %v172_v30 = vpop.permute.xlu1 %171 }
 0x14d   :  { %v176_v32 = vsel %vm175_vm4, %v170_v16, %v172_v30  ;;  %v185_v33 = vsel %vm175_vm4, %v172_v30, %v154_v61 }
 0x14e   :  { %v229_v27 = vcombine.low %v220_v25, %v227_v26  ;;  %v245_v35 = vcombine.low %v176_v32, %v185_v33 }
 0x150   :  { %v243_v29 = vrot.slane %v229_v27, %v1791_v12  ;;  %v252_v38 = vrot.slane %v245_v35, %v1791_v12 }
 0x152   :  { %v244_v31 = vcombine.low %v236_v28, %v243_v29  ;;  %v259_v53 = vrot.slane %v252_v38, %v1791_v12 }
 0x154   :  { %v262_v34 = vadd.f32 %v244_v31, %v1722_v39  ;;  %v263_v58 = vadd.f32 %v259_v53, %v1732_v42 }
 0x156   :  { %v273_v36 = vrot.slane %v262_v34, %v1685_v4  ;;  %v269_v37 = vrot.slane %v262_v34, %v1682_v3  ;;  %v281_v51 = vrot.slane %v262_v34, %v1691_v6  ;;  %v277_v52 = vrot.slane %v262_v34, %v1688_v5 }
 0x157   :  { %v289_v39 = vrot.slane %v262_v34, %v1697_v9  ;;  %v285_v55 = vrot.slane %v262_v34, %v1694_v7  ;;  %v297_v56 = vrot.slane %v262_v34, %v1712_v21  ;;  %v293_v57 = vrot.slane %v262_v34, %v1704_v14 }
 0x158   :  { %318 = vrot.lane.b32.xlu1 %v273_v36, %s1651_s11  ;;  %316 = vrot.lane.b32.xlu0 %v269_v37, %s1651_s11  ;;  %v305_v59 = vrot.slane %v263_v58, %v1685_v4  ;;  %v301_v60 = vrot.slane %v263_v58, %v1682_v3 }
 0x15c   :  { %322 = vrot.lane.b32.xlu1 %v281_v51, %s1651_s11  ;;  %320 = vrot.lane.b32.xlu0 %v277_v52, %s1651_s11 }
 0x160   :  { %326 = vrot.lane.b32.xlu1 %v289_v39, %s1651_s11  ;;  %324 = vrot.lane.b32.xlu0 %v285_v55, %s1651_s11 }
 0x164   :  { %330 = vrot.lane.b32.xlu1 %v297_v56, %s1651_s11  ;;  %328 = vrot.lane.b32.xlu0 %v293_v57, %s1651_s11 }
 0x168   :  { %334 = vrot.lane.b32.xlu1 %v305_v59, %s1651_s11  ;;  %332 = vrot.lane.b32.xlu0 %v301_v60, %s1651_s11 }
 0x1ca   :  { %v319_v61 = vpop.permute.xlu1 %318  ;;  %v317_v62 = vpop.permute.xlu0 %316 }
 0x1cb   :  { %v345_v17 = vsel %vm336_vm5, %v317_v62, %v319_v61 }
 0x1ce   :  { %v323_v63 = vpop.permute.xlu1 %322  ;;  %v321_v8 = vpop.permute.xlu0 %320 }
 0x1cf   :  { %v343_v42 = vsel %vm336_vm5, %v321_v8, %v323_v63  ;;  %v344_v13 = vsel %vm336_vm5, %v319_v61, %v321_v8 }
 0x1d0   :  { %v357_v19 = vcombine.low %v345_v17, %v344_v13 }
 0x1d2   :  { %v327_v0 = vpop.permute.xlu1 %326  ;;  %v325_v10 = vpop.permute.xlu0 %324  ;;  %v367_v27 = vrot.slane %v357_v19, %v1791_v12 }
 0x1d3   :  { %v342_v11 = vsel %vm336_vm5, %v323_v63, %v325_v10  ;;  %v341_v22 = vsel %vm336_vm5, %v325_v10, %v327_v0 }
 0x1d4   :  { %v358_v15 = vcombine.low %v343_v42, %v342_v11 }
 0x1d6   :  { %v329_v16 = vpop.permute.xlu0 %328  ;;  %v331_v20 = vpop.permute.xlu1 %330  ;;  %v374_v23 = vrot.slane %v358_v15, %v1791_v12 }
 0x1d7   :  { %v340_v18 = vsel %vm336_vm5, %v327_v0, %v329_v16  ;;  %v339_v25 = vsel %vm336_vm5, %v329_v16, %v331_v20 }
 0x1d8   :  { %v359_v24 = vcombine.low %v341_v22, %v340_v18  ;;  %v389_v29 = vcombine.low %v367_v27, %v374_v23 }
 0x1da   :  { %v333_v2 = vpop.permute.xlu0 %332  ;;  %v381_v30 = vrot.slane %v359_v24, %v1791_v12  ;;  %v397_v33 = vrot.slane %v389_v29, %v1791_v12  ;;  %v335_v35 = vpop.permute.xlu1 %334 }
 0x1db   :  { %v338_v26 = vsel %vm336_vm5, %v331_v20, %v333_v2  ;;  %v346_v38 = vsel %vm336_vm5, %v335_v35, %v317_v62  ;;  %v337_v51 = vsel %vm336_vm5, %v333_v2, %v335_v35 }
 0x1dc   :  { %v360_v28 = vcombine.low %v339_v25, %v338_v26  ;;  %v406_v53 = vcombine.low %v337_v51, %v346_v38 }
 0x1de   :  { %v388_v31 = vrot.slane %v360_v28, %v1791_v12  ;;  %v413_v56 = vrot.slane %v406_v53, %v1791_v12 }
 0x1e0   :  { %v390_v32 = vcombine.low %v381_v30, %v388_v31 }
 0x1e2   :  { %v404_v36 = vrot.slane %v390_v32, %v1791_v12 }
 0x1e4   :  { %v405_v37 = vcombine.low %v397_v33, %v404_v36 }
 0x1e6   :  { %v1850_v52 = vadd.f32 %v405_v37, %v262_v34  ;;  %v420_v34 = vrot.slane %v413_v56, %v1791_v12 }
 0x1e8   :  { %v434_v39 = vrot.slane %v1850_v52, %v1685_v4  ;;  %v430_v55 = vrot.slane %v1850_v52, %v1682_v3  ;;  %v442_v57 = vrot.slane %v1850_v52, %v1691_v6  ;;  %v438_v59 = vrot.slane %v1850_v52, %v1688_v5 }
 0x1e9   :  { %v1864_v60 = vrot.slane %v1850_v52, %v1697_v9  ;;  %v1868_v61 = vrot.slane %v1850_v52, %v1694_v7  ;;  %v1874_v62 = vrot.slane %v1850_v52, %v1712_v21  ;;  %v1878_v63 = vrot.slane %v1850_v52, %v1704_v14 }
 0x1ea   :  { %479 = vrot.lane.b32.xlu1 %v434_v39, %s1652_s12  ;;  %477 = vrot.lane.b32.xlu0 %v430_v55, %s1652_s12  ;;  %v424_v8 = vadd.f32 %v420_v34, %v263_v58 }
 0x1ec   :  { %v1883_v0 = vrot.slane %v424_v8, %v1685_v4  ;;  %v1886_v10 = vrot.slane %v424_v8, %v1682_v3 }
 0x1ee   :  { %483 = vrot.lane.b32.xlu1 %v442_v57, %s1652_s12  ;;  %481 = vrot.lane.b32.xlu0 %v438_v59, %s1652_s12 }
 0x1f2   :  { %487 = vrot.lane.b32.xlu1 %v1864_v60, %s1652_s12  ;;  %485 = vrot.lane.b32.xlu0 %v1868_v61, %s1652_s12 }
 0x1f6   :  { %491 = vrot.lane.b32.xlu1 %v1874_v62, %s1652_s12  ;;  %489 = vrot.lane.b32.xlu0 %v1878_v63, %s1652_s12 }
 0x1fa   :  { %495 = vrot.lane.b32.xlu1 %v1883_v0, %s1652_s12  ;;  %493 = vrot.lane.b32.xlu0 %v1886_v10, %s1652_s12 }
 0x1fe   :  { %1048 = vrot.lane.b32.xlu1 %v430_v55, %s1653_s13  ;;  %1050 = vrot.lane.b32.xlu0 %v434_v39, %s1653_s13 }
 0x202   :  { %1052 = vrot.lane.b32.xlu1 %v438_v59, %s1653_s13  ;;  %1054 = vrot.lane.b32.xlu0 %v442_v57, %s1653_s13 }
 0x25c   :  { %v480_v58 = vpop.permute.xlu1 %479  ;;  %v478_v11 = vpop.permute.xlu0 %477 }
 0x25d   :  { %v506_v24 = vsel %vm497_vm6, %v478_v11, %v480_v58 }
 0x260   :  { %v484_v42 = vpop.permute.xlu1 %483  ;;  %v482_v13 = vpop.permute.xlu0 %481 }
 0x261   :  { %v504_v18 = vsel %vm497_vm6, %v482_v13, %v484_v42  ;;  %v505_v19 = vsel %vm497_vm6, %v480_v58, %v482_v13 }
 0x262   :  { %v518_v25 = vcombine.low %v506_v24, %v505_v19 }
 0x264   :  { %v488_v15 = vpop.permute.xlu1 %487  ;;  %v486_v16 = vpop.permute.xlu0 %485  ;;  %v528_v36 = vrot.slane %v518_v25, %v1791_v12 }
 0x265   :  { %v503_v17 = vsel %vm497_vm6, %v484_v42, %v486_v16  ;;  %v502_v26 = vsel %vm497_vm6, %v486_v16, %v488_v15 }
 0x266   :  { %v519_v20 = vcombine.low %v504_v18, %v503_v17 }
 0x268   :  { %v492_v22 = vpop.permute.xlu1 %491  ;;  %v490_v23 = vpop.permute.xlu0 %489  ;;  %v535_v27 = vrot.slane %v519_v20, %v1791_v12 }
 0x269   :  { %v501_v2 = vsel %vm497_vm6, %v488_v15, %v490_v23  ;;  %v500_v31 = vsel %vm497_vm6, %v490_v23, %v492_v22 }
 0x26a   :  { %v520_v28 = vcombine.low %v502_v26, %v501_v2  ;;  %v550_v51 = vcombine.low %v528_v36, %v535_v27 }
 0x26c   :  { %v496_v29 = vpop.permute.xlu1 %495  ;;  %v494_v30 = vpop.permute.xlu0 %493  ;;  %v542_v53 = vrot.slane %v520_v28, %v1791_v12  ;;  %v558_v59 = vrot.slane %v550_v51, %v1791_v12 }
 0x26d   :  { %v507_v32 = vsel %vm497_vm6, %v496_v29, %v478_v11  ;;  %v498_v33 = vsel %vm497_vm6, %v494_v30, %v496_v29  ;;  %v499_v35 = vsel %vm497_vm6, %v492_v22, %v494_v30 }
 0x26e   :  { %v521_v37 = vcombine.low %v500_v31, %v499_v35  ;;  %v567_v38 = vcombine.low %v498_v33, %v507_v32 }
 0x270   :  { %v549_v39 = vrot.slane %v521_v37, %v1791_v12  ;;  %v574_v55 = vrot.slane %v567_v38, %v1791_v12 }
 0x272   :  { %v551_v56 = vcombine.low %v542_v53, %v549_v39  ;;  %v581_v57 = vrot.slane %v574_v55, %v1791_v12 }
 0x274   :  { %v565_v34 = vrot.slane %v551_v56, %v1791_v12  ;;  %v1923_v58 = vadd.f32 %v581_v57, %v424_v8 }
 0x276   :  { %v566_v11 = vcombine.low %v558_v59, %v565_v34  ;;  %v1927_v42 = vrot.slane %v1923_v58, %v1685_v4  ;;  %v623_v13 = vrot.slane %v1923_v58, %v1682_v3 }
 0x278   :  { %v1932_v15 = vadd.f32 %v566_v11, %v1850_v52  ;;  %656 = vrot.lane.b32.xlu1 %v1927_v42, %s1654_s14  ;;  %654 = vrot.lane.b32.xlu0 %v623_v13, %s1654_s14 }
 0x27a   :  { %v595_v16 = vrot.slane %v1932_v15, %v1685_v4  ;;  %v603_v8 = vrot.slane %v1932_v15, %v1691_v6  ;;  %v591_v17 = vrot.slane %v1932_v15, %v1682_v3  ;;  %v611_v52 = vrot.slane %v1932_v15, %v1697_v9 }
 0x27b   :  { %v599_v18 = vrot.slane %v1932_v15, %v1688_v5  ;;  %v619_v19 = vrot.slane %v1932_v15, %v1712_v21  ;;  %v607_v20 = vrot.slane %v1932_v15, %v1694_v7  ;;  %v615_v22 = vrot.slane %v1932_v15, %v1704_v14 }
 0x27c   :  { %640 = vrot.lane.b32.xlu1 %v595_v16, %s1654_s14  ;;  %1033 = vrot.lane.b32.xlu0 %v623_v13, %s1655_s15 }
 0x280   :  { %644 = vrot.lane.b32.xlu1 %v603_v8, %s1654_s14  ;;  %638 = vrot.lane.b32.xlu0 %v591_v17, %s1654_s14 }
 0x284   :  { %648 = vrot.lane.b32.xlu1 %v611_v52, %s1654_s14  ;;  %642 = vrot.lane.b32.xlu0 %v599_v18, %s1654_s14 }
 0x288   :  { %652 = vrot.lane.b32.xlu1 %v619_v19, %s1654_s14  ;;  %646 = vrot.lane.b32.xlu0 %v607_v20, %s1654_s14 }
 0x28c   :  { %1056 = vrot.lane.b32.xlu1 %v1868_v61, %s1653_s13  ;;  %650 = vrot.lane.b32.xlu0 %v615_v22, %s1654_s14 }
 0x290   :  { %1060 = vrot.lane.b32.xlu1 %v1878_v63, %s1653_s13  ;;  %1058 = vrot.lane.b32.xlu0 %v1864_v60, %s1653_s13 }
 0x294   :  { %1064 = vrot.lane.b32.xlu1 %v1886_v10, %s1653_s13  ;;  %1062 = vrot.lane.b32.xlu0 %v1874_v62, %s1653_s13 }
 0x298   :  { %1169 = vrot.lane.b32.xlu1 %v1726_v40, %s1656_s16  ;;  %1167 = vrot.lane.b32.xlu0 %v1730_v41, %s1656_s16  ;;  %v1984_v40 = vpop.permute.xlu1 %1048  ;;  %v1986_v41 = vpop.permute.xlu0 %1050 }
 0x29c   :  { %1173 = vrot.lane.b32.xlu1 %v1748_v45, %s1656_s16  ;;  %1171 = vrot.lane.b32.xlu0 %v1738_v43, %s1656_s16  ;;  %v1988_v43 = vpop.permute.xlu1 %1052  ;;  %v1990_v45 = vpop.permute.xlu0 %1054 }
 0x2a0   :  { %1177 = vrot.lane.b32.xlu1 %v1758_v47, %s1656_s16  ;;  %1175 = vrot.lane.b32.xlu0 %v1753_v46, %s1656_s16 }
 0x2a4   :  { %1019 = vrot.lane.b32.xlu1 %v595_v16, %s1655_s15  ;;  %1179 = vrot.lane.b32.xlu0 %v1763_v48, %s1656_s16 }
 0x2a8   :  { %1023 = vrot.lane.b32.xlu1 %v603_v8, %s1655_s15  ;;  %1017 = vrot.lane.b32.xlu0 %v591_v17, %s1655_s15 }
 0x2ac   :  { %1027 = vrot.lane.b32.xlu1 %v611_v52, %s1655_s15  ;;  %1021 = vrot.lane.b32.xlu0 %v599_v18, %s1655_s15 }
 0x2b0   :  { %1031 = vrot.lane.b32.xlu1 %v619_v19, %s1655_s15  ;;  %1025 = vrot.lane.b32.xlu0 %v607_v20, %s1655_s15 }
 0x2b4   :  { %1029 = vrot.lane.b32.xlu0 %v615_v22, %s1655_s15 }
 0x2ea   :  { %v657_v46 = vpop.permute.xlu1 %656  ;;  %v655_v47 = vpop.permute.xlu0 %654 }
 0x2eb   :  { %v659_v63 = vsel %vm658_vm7, %v655_v47, %v657_v46 }
 0x2ee   :  { %v641_v48 = vpop.permute.xlu1 %640  ;;  %v1992_v60 = vpop.permute.xlu0 %1033 }
 0x2f2   :  { %v645_v61 = vpop.permute.xlu1 %644  ;;  %v639_v62 = vpop.permute.xlu0 %638 }
 0x2f3   :  { %v668_v10 = vsel %vm658_vm7, %v657_v46, %v639_v62  ;;  %v667_v31 = vsel %vm658_vm7, %v639_v62, %v641_v48 }
 0x2f4   :  { %v728_v23 = vcombine.low %v659_v63, %v668_v10 }
 0x2f6   :  { %v735_v24 = vrot.slane %v728_v23, %v1791_v12  ;;  %v649_v2 = vpop.permute.xlu1 %648  ;;  %v643_v25 = vpop.permute.xlu0 %642 }
 0x2f7   :  { %v666_v27 = vsel %vm658_vm7, %v641_v48, %v643_v25  ;;  %v665_v32 = vsel %vm658_vm7, %v643_v25, %v645_v61 }
 0x2f8   :  { %v742_v26 = vrot.slane %v735_v24, %v1791_v12  ;;  %v679_v35 = vcombine.low %v667_v31, %v666_v27 }
 0x2fa   :  { %v653_v28 = vpop.permute.xlu1 %652  ;;  %v647_v29 = vpop.permute.xlu0 %646  ;;  %v2004_v30 = vadd.f32 %v742_v26, %v1923_v58  ;;  %v689_v59 = vrot.slane %v679_v35, %v1791_v12 }
 0x2fb   :  { %v664_v33 = vsel %vm658_vm7, %v645_v61, %v647_v29  ;;  %v660_v39 = vsel %vm658_vm7, %v653_v28, %v655_v47  ;;  %v663_v55 = vsel %vm658_vm7, %v647_v29, %v649_v2 }
 0x2fc   :  { %v680_v36 = vcombine.low %v665_v32, %v664_v33  ;;  %v784_v37 = vrot.slane %v2004_v30, %v1682_v3 }
 0x2fe   :  { %v696_v38 = vrot.slane %v680_v36, %v1791_v12  ;;  %v2015_v51 = vpop.permute.xlu1 %1056  ;;  %924 = vrot.lane.b32.xlu1 %v784_v37, %s1657_s17  ;;  %815 = vrot.lane.b32.xlu0 %v784_v37, %s1658_s18  ;;  %v651_v53 = vpop.permute.xlu0 %650 }
 0x2ff   :  { %v661_v56 = vsel %vm658_vm7, %v651_v53, %v653_v28  ;;  %v662_v57 = vsel %vm658_vm7, %v649_v2, %v651_v53 }
 0x300   :  { %v681_v34 = vcombine.low %v663_v55, %v662_v57  ;;  %v682_v58 = vcombine.low %v661_v56, %v660_v39  ;;  %v711_v11 = vcombine.low %v689_v59, %v696_v38 }
 0x302   :  { %v703_v13 = vrot.slane %v681_v34, %v1791_v12  ;;  %v710_v16 = vrot.slane %v682_v58, %v1791_v12  ;;  %v1061_v8 = vpop.permute.xlu1 %1060  ;;  %v1059_v17 = vpop.permute.xlu0 %1058  ;;  %v719_v20 = vrot.slane %v711_v11, %v1791_v12 }
 0x303   :  { %v2033_v52 = vsel %vm1068_vm8, %v1059_v17, %v1061_v8  ;;  %v2038_v18 = vsel %vm1068_vm8, %v2015_v51, %v1059_v17  ;;  %v1076_v17 = vsel %vm1068_vm8, %v1986_v41, %v1988_v43 }
 0x304   :  { %v712_v19 = vcombine.low %v703_v13, %v710_v16 }
 0x306   :  { %v726_v22 = vrot.slane %v712_v19, %v1791_v12  ;;  %v2042_v46 = vpop.permute.xlu1 %1064  ;;  %v2044_v47 = vpop.permute.xlu0 %1062 }
 0x307   :  { %v2049_v48 = vsel %vm1068_vm8, %v1061_v8, %v2044_v47 }
 0x308   :  { %v727_v61 = vcombine.low %v719_v20, %v726_v22  ;;  %v1077_v20 = vsel %vm1068_vm8, %v1984_v40, %v1986_v41  ;;  %v1074_v41 = vsel %vm1068_vm8, %v1990_v45, %v2015_v51 }
 0x30a   :  { %v2052_v62 = vadd.f32 %v727_v61, %v1932_v15  ;;  %v1170_v63 = vpop.permute.xlu1 %1169  ;;  %v2054_v10 = vpop.permute.xlu0 %1167 }
 0x30b   :  { %v1196_v15 = vsel %vm1187_vm9, %v2054_v10, %v1170_v63 }
 0x30c   :  { %v756_v23 = vrot.slane %v2052_v62, %v1685_v4  ;;  %v752_v24 = vrot.slane %v2052_v62, %v1682_v3  ;;  %v764_v28 = vrot.slane %v2052_v62, %v1691_v6  ;;  %v760_v29 = vrot.slane %v2052_v62, %v1688_v5 }
 0x30d   :  { %v772_v37 = vrot.slane %v2052_v62, %v1697_v9  ;;  %v768_v38 = vrot.slane %v2052_v62, %v1694_v7  ;;  %v780_v59 = vrot.slane %v2052_v62, %v1712_v21  ;;  %v776_v34 = vrot.slane %v2052_v62, %v1704_v14 }
 0x30e   :  { %v1174_v2 = vpop.permute.xlu1 %1173  ;;  %801 = vrot.lane.b32.xlu1 %v756_v23, %s1658_s18  ;;  %799 = vrot.lane.b32.xlu0 %v752_v24, %s1658_s18  ;;  %v1172_v25 = vpop.permute.xlu0 %1171 }
 0x30f   :  { %v1195_v26 = vsel %vm1187_vm9, %v1170_v63, %v1172_v25  ;;  %v1194_v33 = vsel %vm1187_vm9, %v1172_v25, %v1174_v2 }
 0x310   :  { %v1208_v27 = vcombine.low %v1196_v15, %v1195_v26 }
 0x312   :  { %v2072_v31 = vpop.permute.xlu1 %1177  ;;  %805 = vrot.lane.b32.xlu1 %v764_v28, %s1658_s18  ;;  %803 = vrot.lane.b32.xlu0 %v760_v29, %s1658_s18  ;;  %v2076_v32 = vpop.permute.xlu0 %1175  ;;  %v2088_v53 = vrot.slane %v1208_v27, %v1791_v12 }
 0x313   :  { %v1193_v35 = vsel %vm1187_vm9, %v1174_v2, %v2076_v32  ;;  %v1075_v2 = vsel %vm1068_vm8, %v1988_v43, %v1990_v45  ;;  %v1070_v43 = vsel %vm1068_vm8, %v2044_v47, %v2042_v46 }
 0x314   :  { %v1209_v36 = vcombine.low %v1194_v33, %v1193_v35 }
 0x316   :  { %v2091_v39 = vrot.slane %v1209_v36, %v1791_v12  ;;  %v1020_v55 = vpop.permute.xlu1 %1019  ;;  %809 = vrot.lane.b32.xlu1 %v772_v37, %s1658_s18  ;;  %807 = vrot.lane.b32.xlu0 %v768_v38, %s1658_s18  ;;  %v2095_v56 = vpop.permute.xlu0 %1179 }
 0x318   :  { %v1240_v57 = vcombine.low %v2088_v53, %v2091_v39 }
 0x31a   :  { %v1024_v58 = vpop.permute.xlu1 %1023  ;;  %813 = vrot.lane.b32.xlu1 %v780_v59, %s1658_s18  ;;  %811 = vrot.lane.b32.xlu0 %v776_v34, %s1658_s18  ;;  %v2105_v11 = vpop.permute.xlu0 %1017 }
 0x31b   :  { %v1046_v13 = vsel %vm1037_vm10, %v2105_v11, %v1020_v55 }
 0x31c   :  { %v1079_v61 = vadd.f32 %v1077_v20, %v1046_v13 }
 0x31e   :  { %v1028_v16 = vpop.permute.xlu1 %1027  ;;  %908 = vrot.lane.b32.xlu1 %v752_v24, %s1657_s17  ;;  %910 = vrot.lane.b32.xlu0 %v756_v23, %s1657_s17  ;;  %v1022_v8 = vpop.permute.xlu0 %1021 }
 0x31f   :  { %v1045_v19 = vsel %vm1037_vm10, %v1020_v55, %v1022_v8  ;;  %v1044_v63 = vsel %vm1037_vm10, %v1022_v8, %v1024_v58 }
 0x320   :  { %v1080_v22 = vadd.f32 %v1076_v17, %v1045_v19  ;;  %v1081_v26 = vadd.f32 %v1075_v2, %v1044_v63 }
 0x322   :  { %v1032_v23 = vpop.permute.xlu1 %1031  ;;  %912 = vrot.lane.b32.xlu1 %v760_v29, %s1657_s17  ;;  %914 = vrot.lane.b32.xlu0 %v764_v28, %s1657_s17  ;;  %v1026_v24 = vpop.permute.xlu0 %1025  ;;  %v1099_v25 = vcombine.low %v1079_v61, %v1080_v22 }
 0x323   :  { %v1043_v15 = vsel %vm1037_vm10, %v1024_v58, %v1026_v24  ;;  %v1039_v27 = vsel %vm1037_vm10, %v1032_v23, %v1992_v60  ;;  %v1042_v29 = vsel %vm1037_vm10, %v1026_v24, %v1028_v16 }
 0x324   :  { %v1082_v28 = vadd.f32 %v1074_v41, %v1043_v15  ;;  %v1109_v51 = vrot.slane %v1099_v25, %v1791_v12  ;;  %v1086_v35 = vadd.f32 %v1070_v43, %v1039_v27  ;;  %v1083_v58 = vadd.f32 %v2038_v18, %v1042_v29 }
 0x326   :  { %v1100_v33 = vcombine.low %v1081_v26, %v1082_v28  ;;  %916 = vrot.lane.b32.xlu1 %v768_v38, %s1657_s17  ;;  %918 = vrot.lane.b32.xlu0 %v772_v37, %s1657_s17  ;;  %v1030_v45 = vpop.permute.xlu0 %1029 }
 0x327   :  { %v1040_v36 = vsel %vm1037_vm10, %v1030_v45, %v1032_v23  ;;  %v1041_v55 = vsel %vm1037_vm10, %v1028_v16, %v1030_v45 }
 0x328   :  { %v1116_v13 = vrot.slane %v1100_v33, %v1791_v12  ;;  %v1084_v47 = vadd.f32 %v2033_v52, %v1041_v55  ;;  %v1085_v38 = vadd.f32 %v2049_v48, %v1040_v36  ;;  %v788_v48 = vrot.slane %v2004_v30, %v1685_v4 }
 0x32a   :  { %v1131_v8 = vcombine.low %v1109_v51, %v1116_v13  ;;  %v1101_v37 = vcombine.low %v1083_v58, %v1084_v47  ;;  %v1102_v17 = vcombine.low %v1085_v38, %v1086_v35  ;;  %920 = vrot.lane.b32.xlu1 %v776_v34, %s1657_s17  ;;  %922 = vrot.lane.b32.xlu0 %v780_v59, %s1657_s17 }
 0x32c   :  { %v1123_v19 = vrot.slane %v1101_v37, %v1791_v12  ;;  %v1130_v20 = vrot.slane %v1102_v17, %v1791_v12  ;;  %v2166_v52 = vrot.slane %v1131_v8, %v1791_v12 }
 0x32e   :  { %v1132_v16 = vcombine.low %v1123_v19, %v1130_v20  ;;  %1181 = vrot.lane.b32.xlu1 %v1768_v49, %s1656_s16  ;;  %1183 = vrot.lane.b32.xlu0 %v1742_v44, %s1656_s16 }
 0x330   :  { %v2169_v18 = vrot.slane %v1132_v16, %v1791_v12 }
 0x332   :  { %v1147_v59 = vcombine.low %v2166_v52, %v2169_v18  ;;  %817 = vrot.lane.b32.xlu1 %v788_v48, %s1658_s18  ;;  %926 = vrot.lane.b32.xlu0 %v788_v48, %s1657_s17 }
 0x336   :  { %1035 = vrot.lane.b32.xlu1 %v1927_v42, %s1655_s15  ;;  %1066 = vrot.lane.b32.xlu0 %v1883_v0, %s1653_s13 }
 0x33a   :  { %1185 = vrot.lane.b32.xlu1 %v1773_v50, %s1656_s16 }
 0x370   :  { %v2183_v44 = vpop.permute.xlu1 %924  ;;  %v2185_v49 = vpop.permute.xlu0 %815 }
 0x380   :  { %v802_v34 = vpop.permute.xlu1 %801  ;;  %v2187_v22 = vpop.permute.xlu0 %799 }
 0x381   :  { %v828_v36 = vsel %vm819_vm11, %v2187_v22, %v802_v34 }
 0x384   :  { %v806_v61 = vpop.permute.xlu1 %805  ;;  %v804_v63 = vpop.permute.xlu0 %803 }
 0x385   :  { %v826_v43 = vsel %vm819_vm11, %v804_v63, %v806_v61  ;;  %v827_v33 = vsel %vm819_vm11, %v802_v34, %v804_v63  ;;  %v1192_v63 = vsel %vm1187_vm9, %v2076_v32, %v2072_v31 }
 0x386   :  { %v840_v55 = vcombine.low %v828_v36, %v827_v33 }
 0x388   :  { %v810_v23 = vpop.permute.xlu1 %809  ;;  %v808_v24 = vpop.permute.xlu0 %807  ;;  %v850_v16 = vrot.slane %v840_v55, %v1791_v12 }
 0x389   :  { %v824_v26 = vsel %vm819_vm11, %v808_v24, %v810_v23  ;;  %v825_v27 = vsel %vm819_vm11, %v806_v61, %v808_v24 }
 0x38a   :  { %v841_v45 = vcombine.low %v826_v43, %v825_v27 }
 0x38c   :  { %v814_v2 = vpop.permute.xlu1 %813  ;;  %v812_v41 = vpop.permute.xlu0 %811  ;;  %v857_v38 = vrot.slane %v841_v45, %v1791_v12 }
 0x38d   :  { %v821_v0 = vsel %vm819_vm11, %v814_v2, %v2185_v49  ;;  %v822_v50 = vsel %vm819_vm11, %v812_v41, %v814_v2  ;;  %v823_v42 = vsel %vm819_vm11, %v810_v23, %v812_v41  ;;  %v1191_v23 = vsel %vm1187_vm9, %v2072_v31, %v2095_v56 }
 0x38e   :  { %v842_v28 = vcombine.low %v824_v26, %v823_v42  ;;  %v843_v29 = vcombine.low %v822_v50, %v821_v0  ;;  %v872_v24 = vcombine.low %v850_v16, %v857_v38 }
 0x390   :  { %v2197_v25 = vpop.permute.xlu1 %908  ;;  %v911_v15 = vpop.permute.xlu0 %910  ;;  %v864_v58 = vrot.slane %v842_v28, %v1791_v12  ;;  %v871_v13 = vrot.slane %v843_v29, %v1791_v12  ;;  %v1210_v29 = vcombine.low %v1192_v63, %v1191_v23  ;;  %v880_v43 = vrot.slane %v872_v24, %v1791_v12 }
 0x391   :  { %v937_v17 = vsel %vm928_vm12, %v2197_v25, %v911_v15 }
 0x392   :  { %v873_v48 = vcombine.low %v864_v58, %v871_v13 }
 0x394   :  { %v913_v51 = vpop.permute.xlu1 %912  ;;  %v915_v35 = vpop.permute.xlu0 %914  ;;  %v887_v31 = vrot.slane %v873_v48, %v1791_v12 }
 0x395   :  { %v936_v47 = vsel %vm928_vm12, %v911_v15, %v913_v51  ;;  %v935_v19 = vsel %vm928_vm12, %v913_v51, %v915_v35 }
 0x396   :  { %v949_v34 = vcombine.low %v937_v17, %v936_v47  ;;  %v888_v13 = vcombine.low %v880_v43, %v887_v31 }
 0x398   :  { %v917_v8 = vpop.permute.xlu1 %916  ;;  %v919_v37 = vpop.permute.xlu0 %918  ;;  %v959_v26 = vrot.slane %v949_v34, %v1791_v12  ;;  %v906_v63 = vadd.f32 %v888_v13, %v2052_v62 }
 0x399   :  { %v934_v20 = vsel %vm928_vm12, %v915_v35, %v917_v8  ;;  %v933_v50 = vsel %vm928_vm12, %v917_v8, %v919_v37  ;;  %v1232_v8 = vrot.slane %v1210_v29, %v1791_v12 }
 0x39a   :  { %v950_v61 = vcombine.low %v935_v19, %v934_v20 }
 0x39c   :  { %v966_v2 = vrot.slane %v950_v61, %v1791_v12  ;;  %v921_v41 = vpop.permute.xlu1 %920  ;;  %v923_v0 = vpop.permute.xlu0 %922 }
 0x39d   :  { %v932_v42 = vsel %vm928_vm12, %v919_v37, %v921_v41  ;;  %v930_v32 = vsel %vm928_vm12, %v923_v0, %v2183_v44  ;;  %v931_v15 = vsel %vm928_vm12, %v921_v41, %v923_v0 }
 0x39e   :  { %v951_v27 = vcombine.low %v933_v50, %v932_v42  ;;  %v952_v28 = vcombine.low %v931_v15, %v930_v32  ;;  %v981_v33 = vcombine.low %v959_v26, %v966_v2 }
 0x3a0   :  { %v973_v45 = vrot.slane %v951_v27, %v1791_v12  ;;  %v980_v51 = vrot.slane %v952_v28, %v1791_v12  ;;  %v1182_v35 = vpop.permute.xlu1 %1181  ;;  %v1184_v36 = vpop.permute.xlu0 %1183  ;;  %v989_v37 = vrot.slane %v981_v33, %v1791_v12 }
 0x3a1   :  { %v1190_v55 = vsel %vm1187_vm9, %v2095_v56, %v1182_v35  ;;  %v1189_v58 = vsel %vm1187_vm9, %v1182_v35, %v1184_v36 }
 0x3a2   :  { %v982_v47 = vcombine.low %v973_v45, %v980_v51  ;;  %v1211_v38 = vcombine.low %v1190_v55, %v1189_v58 }
 0x3a4   :  { %v996_v17 = vrot.slane %v982_v47, %v1791_v12  ;;  %v1239_v19 = vrot.slane %v1211_v38, %v1791_v12  ;;  %v818_v20 = vpop.permute.xlu1 %817  ;;  %v927_v16 = vpop.permute.xlu0 %926 }
 0x3a5   :  { %v820_v56 = vsel %vm819_vm11, %v2185_v49, %v818_v20  ;;  %v829_v48 = vsel %vm819_vm11, %v818_v20, %v2187_v22  ;;  %v929_v34 = vsel %vm928_vm12, %v2183_v44, %v927_v16  ;;  %v938_v61 = vsel %vm928_vm12, %v927_v16, %v2197_v25 }
 0x3a6   :  { %v997_v23 = vcombine.low %v989_v37, %v996_v17  ;;  %v1241_v24 = vcombine.low %v1232_v8, %v1239_v19  ;;  %v889_v2 = vcombine.low %v820_v56, %v829_v48  ;;  %v1248_v49 = vrot.slane %v1240_v57, %v1791_v12 }
 0x3a7   :  { %v998_v44 = vcombine.low %v929_v34, %v938_v61 }
 0x3a8   :  { %v1015_v41 = vadd.f32 %v997_v23, %v906_v63  ;;  %v1255_v22 = vrot.slane %v1241_v24, %v1791_v12  ;;  %v896_v0 = vrot.slane %v889_v2, %v1791_v12  ;;  %v1036_v50 = vpop.permute.xlu1 %1035  ;;  %v1067_v42 = vpop.permute.xlu0 %1066 }
 0x3a9   :  { %v1038_v62 = vsel %vm1037_vm10, %v1992_v60, %v1036_v50  ;;  %v1047_v25 = vsel %vm1037_vm10, %v1036_v50, %v2105_v11  ;;  %v1069_v53 = vsel %vm1068_vm8, %v2042_v46, %v1067_v42  ;;  %v1078_v39 = vsel %vm1068_vm8, %v1067_v42, %v1984_v40 }
 0x3aa   :  { %v1165_v57 = vadd.f32 %v1147_v59, %v1015_v41  ;;  %v1256_v32 = vcombine.low %v1248_v49, %v1255_v22  ;;  %v1087_v15 = vadd.f32 %v1069_v53, %v1038_v62  ;;  %v1088_v31 = vadd.f32 %v1078_v39, %v1047_v25 }
 0x3ab   :  { %v903_v26 = vrot.slane %v896_v0, %v1791_v12  ;;  %v1005_v11 = vrot.slane %v998_v44, %v1791_v12  ;;  %v1366_v62 = vadd.s32 1024, %v1777_v54 }
 0x3ac   :  { %v1274_v60 = vadd.f32 %v1256_v32, %v1165_v57  ;;  %v1186_v27 = vpop.permute.xlu1 %1185  ;;  %v1148_v28 = vcombine.low %v1087_v15, %v1088_v31 }
 0x3ad   :  { %v1188_v46 = vsel %vm1187_vm9, %v1184_v36, %v1186_v27  ;;  %v1197_v40 = vsel %vm1187_vm9, %v1186_v27, %v2054_v10  ;;  %v907_v43 = vadd.f32 %v903_v26, %v2004_v30  ;;  %v1012_v33 = vrot.slane %v1005_v11, %v1791_v12 }
 0x3ae   :  { %v1257_v29 = vcombine.low %v1188_v46, %v1197_v40  ;;  %v1285_v52 = vrot.slane %v1274_v60, %v1685_v4  ;;  %v1281_v18 = vrot.slane %v1274_v60, %v1682_v3  ;;  %v1155_v59 = vrot.slane %v1148_v28, %v1791_v12 }
 0x3af   :  { %v1293_v10 = vrot.slane %v1274_v60, %v1691_v6  ;;  %v1289_v35 = vrot.slane %v1274_v60, %v1688_v5  ;;  %v1016_v4 = vadd.f32 %v1012_v33, %v907_v43  ;;  %v1301_v30 = vrot.slane %v1274_v60, %v1697_v9 }
 0x3b0   :  { %1330 = vrot.lane.b32.xlu1 %v1285_v52, %s1659_s19  ;;  %1328 = vrot.lane.b32.xlu0 %v1281_v18, %s1659_s19  ;;  %v1162_v45 = vrot.slane %v1155_v59, %v1791_v12  ;;  %v1264_v51 = vrot.slane %v1257_v29, %v1791_v12  ;;  %v1297_v55 = vrot.slane %v1274_v60, %v1694_v7  ;;  %v1428_v9 = vrot.slane %v1648_v1, 7 }
 0x3b1   :  { %v1309_v13 = vrot.slane %v1274_v60, %v1712_v21  ;;  %v1305_v47 = vrot.slane %v1274_v60, %v1704_v14  ;;  %vm1386_vm15 = vcmp.lt.s32.totalorder %v1366_v62, 1128 }
 0x3b2   :  { %v1271_v36 = vrot.slane %v1264_v51, %v1791_v12  ;;  %v1166_v58 = vadd.f32 %v1162_v45, %v1016_v4 }
 0x3b4   :  { %1334 = vrot.lane.b32.xlu1 %v1293_v10, %s1659_s19  ;;  %1332 = vrot.lane.b32.xlu0 %v1289_v35, %s1659_s19  ;;  %v1275_v38 = vadd.f32 %v1271_v36, %v1166_v58 }
 0x3b6   :  { %v1313_v5 = vrot.slane %v1275_v38, %v1682_v3  ;;  %v1448_v3 = vsel %vm63_vm1, 0.0, %v1428_v9 }
 0x3b7   :  { %v1459_v34 = vsel %vm1458_vm14, %v1448_v3, 0.0 }
 0x3b8   :  { %1338 = vrot.lane.b32.xlu1 %v1301_v30, %s1659_s19  ;;  %1336 = vrot.lane.b32.xlu0 %v1297_v55, %s1659_s19 }
 0x3bc   :  { %1342 = vrot.lane.b32.xlu1 %v1309_v13, %s1659_s19  ;;  %1340 = vrot.lane.b32.xlu0 %v1305_v47, %s1659_s19 }
 0x3c0   :  { %1344 = vrot.lane.b32.xlu0 %v1313_v5, %s1659_s19 }
 0x422   :  { %v1331_v6 = vpop.permute.xlu1 %1330  ;;  %v1329_v8 = vpop.permute.xlu0 %1328 }
 0x423   :  { %v2316_v7 = vsel %vm1348_vm13, %v1329_v8, %v1331_v6 }
 0x424   :  { %v1409_v21 = vmul.f32 %v2316_v7, %v2316_v7 }
 0x426   :  { %v1429_v14 = vrot.slane %v1409_v21, 7  ;;  %v1335_v37 = vpop.permute.xlu1 %1334  ;;  %v1333_v17 = vpop.permute.xlu0 %1332 }
 0x427   :  { %v2323_v19 = vsel %vm1348_vm13, %v1333_v17, %v1335_v37  ;;  %v2327_v1 = vsel %vm1348_vm13, %v1331_v6, %v1333_v17  ;;  %v1660_v6 = vmov 0  }
 0x428   :  { %v1449_v20 = vsel %vm63_vm1, %v2316_v7, %v1429_v14  ;;  %v1410_v16 = vmul.f32 %v2327_v1, %v2327_v1  ;;  %v1411_v56 = vmul.f32 %v2323_v19, %v2323_v19  ;;  %1600 = vset.pattern.permute.xlu0 %v1660_v6 }
 0x429   :  { %v1460_v48 = vsel %vm1458_vm14, %v1449_v20, 0.0 }
 0x42a   :  { %v1430_v61 = vrot.slane %v1410_v16, 7  ;;  %v1431_v63 = vrot.slane %v1411_v56, 7  ;;  %v1339_v23 = vpop.permute.xlu1 %1338  ;;  %v1337_v24 = vpop.permute.xlu0 %1336  ;;  %v1461_v44 = vadd.f32 %v1460_v48, %v1459_v34 }
 0x42b   :  { %v2339_v2 = vsel %vm1348_vm13, %v1337_v24, %v1339_v23  ;;  %v2343_v49 = vsel %vm1348_vm13, %v1335_v37, %v1337_v24 }
 0x42c   :  { %v1450_v41 = vsel %vm63_vm1, %v2327_v1, %v1430_v61  ;;  %v1412_v22 = vmul.f32 %v2343_v49, %v2343_v49  ;;  %v1413_v0 = vmul.f32 %v2339_v2, %v2339_v2  ;;  %v1451_v50 = vsel %vm63_vm1, %v2323_v19, %v1431_v63 }
 0x42d   :  { %v1462_v42 = vsel %vm1458_vm14, %v1450_v41, 0.0  ;;  %v1464_v60 = vsel %vm1458_vm14, %v1451_v50, 0.0 }
 0x42e   :  { %v1432_v25 = vrot.slane %v1412_v22, 7  ;;  %v1433_v53 = vrot.slane %v1413_v0, 7  ;;  %v1343_v39 = vpop.permute.xlu1 %1342  ;;  %v1341_v57 = vpop.permute.xlu0 %1340  ;;  %v1463_v32 = vadd.f32 %v1462_v42, %v1461_v44 }
 0x42f   :  { %v1351_v15 = vsel %vm1348_vm13, %v1341_v57, %v1343_v39  ;;  %v1352_v31 = vsel %vm1348_vm13, %v1339_v23, %v1341_v57 }
 0x430   :  { %v1452_v26 = vsel %vm63_vm1, %v2343_v49, %v1432_v25  ;;  %v1414_v27 = vmul.f32 %v1352_v31, %v1352_v31  ;;  %v1415_v11 = vmul.f32 %v1351_v15, %v1351_v15  ;;  %v1453_v28 = vsel %vm63_vm1, %v2339_v2, %v1433_v53 }
 0x431   :  { %v1466_v46 = vsel %vm1458_vm14, %v1452_v26, 0.0  ;;  %v1465_v40 = vadd.f32 %v1464_v60, %v1463_v32  ;;  %v1468_v33 = vsel %vm1458_vm14, %v1453_v28, 0.0 }
 0x432   :  { %v1434_v29 = vrot.slane %v1414_v27, 7  ;;  %v1435_v52 = vrot.slane %v1415_v11, 7  ;;  %v1345_v18 = vpop.permute.xlu0 %1344 }
 0x433   :  { %v1350_v59 = vsel %vm1348_vm13, %v1343_v39, %v1345_v18  ;;  %v1467_v43 = vadd.f32 %v1466_v46, %v1465_v40 }
 0x434   :  { %v1454_v45 = vsel %vm63_vm1, %v1352_v31, %v1434_v29  ;;  %v1406_v51 = vsel %vm1386_vm15, %v1350_v59, 0.0  ;;  %v1455_v10 = vsel %vm63_vm1, %v1351_v15, %v1435_v52 }
 0x435   :  { %v1470_v35 = vsel %vm1458_vm14, %v1454_v45, 0.0  ;;  %v1416_v4 = vmul.f32 %v1406_v51, %v1406_v51  ;;  %v1469_v36 = vadd.f32 %v1468_v33, %v1467_v43  ;;  %v1472_v58 = vsel %vm1458_vm14, %v1455_v10, 0.0 }
 0x437   :  { %v1436_v30 = vrot.slane %v1416_v4, 7  ;;  %v1471_v55 = vadd.f32 %v1470_v35, %v1469_v36 }
 0x439   :  { %v1456_v13 = vsel %vm63_vm1, %v1406_v51, %v1436_v30  ;;  %v1473_v54 = vadd.f32 %v1472_v58, %v1471_v55 }
 0x43a   :  { %v1474_v47 = vsel %vm1458_vm14, %v1456_v13, 0.0 }
 0x43b   :  { %v1475_v38 = vadd.f32 %v1474_v47, %v1473_v54 }
 0x43d   :  { %v1477_v5 = vadd.f32 %v1475_v38, %v1459_v34 }
 0x43f   :  { %1478 = vadd.xlane.f32.xlu1 %v1477_v5 }
 0x4c8   :  { %v1479_v8 = vpop.xlane.xlu1 %1478 }
 0x4c9   :  { %v1480_v9 = vmul.f32 0.001, %v1479_v8 }
 0x4cb   :  { %v1481_v21 = vmul.f32 1000.0, %v1480_v9  ;;  %v1489_v56 = vsub.f32 %v2316_v7, %v1480_v9  ;;  %v1490_v61 = vsub.f32 %v2327_v1, %v1480_v9  ;;  %v1491_v34 = vsub.f32 %v2323_v19, %v1480_v9 }
 0x4cc   :  { %v1492_v63 = vsub.f32 %v2343_v49, %v1480_v9  ;;  %v1493_v23 = vsub.f32 %v2339_v2, %v1480_v9  ;;  %v1494_v24 = vsub.f32 %v1352_v31, %v1480_v9  ;;  %v1495_v41 = vsub.f32 %v1351_v15, %v1480_v9 }
 0x4cd   :  { %v1482_v14 = vmul.f32 %v1481_v21, %v1480_v9  ;;  %v1496_v22 = vsub.f32 %v1350_v59, %v1480_v9 }
 0x4cf   :  { %v1484_v37 = vrot.slane %v1482_v14, 7 }
 0x4d1   :  { %v1486_v17 = vsub.f32 %v1479_v8, %v1484_v37 }
 0x4d3   :  { %v1487_v3 = vmul.f32 0.001001001, %v1486_v17 }
 0x4d5   :  { %1601 = vrsqrt.f32 %v1487_v3 }
 0x4e2   :  { %v1602_v20 = vpop.eup %1601 }
 0x4e3   :  { %1499 = vperm.xlu0 %1600, %v1602_v20  }
 0x55e   :  { %v1500_v16 = vpop.permute.xlu0 %1499 }
 0x55f   :  { %v1501_v48 = vrot.slane %v1500_v16, 1 }
 0x561   :  { %v1503_v0 = vmul.f32 %v1501_v48, %v1489_v56  ;;  %v1504_v44 = vmul.f32 %v1501_v48, %v1490_v61  ;;  %v1505_v50 = vmul.f32 %v1501_v48, %v1491_v34  ;;  %v1506_v42 = vmul.f32 %v1501_v48, %v1492_v63 }
 0x562   :  { %v1507_v62 = vmul.f32 %v1501_v48, %v1493_v23  ;;  %v1508_v25 = vmul.f32 %v1501_v48, %v1494_v24  ;;  %v1509_v53 = vmul.f32 %v1501_v48, %v1495_v41  ;;  %v1510_v7 = vmul.f32 %v1501_v48, %v1496_v22 }
 0x563   :  { %v1519_v39 = vcombine.low %v1503_v0, %v1504_v44  ;;  %v1520_v57 = vcombine.low %v1505_v50, %v1506_v42 }
 0x564   :  { %v1521_v1 = vcombine.low %v1507_v62, %v1508_v25  ;;  %v1522_v32 = vcombine.low %v1509_v53, %v1510_v7 }
 0x565   :  { %v1529_v19 = vrot.slane %v1519_v39, %v1791_v12  ;;  %v1536_v49 = vrot.slane %v1520_v57, %v1791_v12 }
 0x566   :  { %v1543_v2 = vrot.slane %v1521_v1, %v1791_v12  ;;  %v1550_v15 = vrot.slane %v1522_v32, %v1791_v12 }
 0x567   :  { %v1551_v31 = vcombine.low %v1529_v19, %v1536_v49 }
 0x568   :  { %v1552_v60 = vcombine.low %v1543_v2, %v1550_v15 }
 0x569   :  { %v1559_v26 = vrot.slane %v1551_v31, %v1791_v12 }
 0x56a   :  { %v1566_v27 = vrot.slane %v1552_v60, %v1791_v12 }
 0x56c   :  { %v1567_v11 = vcombine.low %v1559_v26, %v1566_v27 }
 0x56e   :  { %1569 = vst [vmem:[#allocation6] sm:$0xff] %v1567_v11 }
 0x56f   :  { %1634 = shalt.err (!%p1631_p9)
}
 0x570   :  { %1579 = dma.vmem_to_hbm [thread:$0]  %s1577_s21, 128, %s2389_s1, [#allocation5]  }
 0x571   :  { %1645 = dma.done.wait [#allocation5], 128  }
 0x572   :  { %1646 = vsyncadd [#allocation5], 4294967168 }
 0x573   :  { %1583 = vsyncpa [#allocation4], 1 }
 0x574   :  { %1584 = vsyncpa [#allocation5], 1 }

</bundles_post_ra>
